<compile_context>
chip_gen: v7x
topology: tpu7x:2x2x1
jax: 0.10.0
libtpu: 0.0.40
codegen_flags: <defaults>
</compile_context>

<pallas_src>
import functools
import math

import jax
import jax.numpy as jnp
from jax.experimental import pallas as pl
from jax.experimental.pallas import tpu as pltpu

LOG_STD_MAX = 2.0
LOG_STD_MIN = -20.0
EPSILON = 1e-6
HALF_LOG_2PI = 0.5 * math.log(2.0 * math.pi)


def _round_up(x, m):
    return (x + m - 1) // m * m


def _cdiv(a, b):
    return (a + b - 1) // b


def actor_kernel(low_ref, soc_ref, eps_ref,
                 w1l_ref, w1s_ref, b1_ref,
                 w2_ref, b2_ref,
                 wh_ref, bh_ref,
                 out_ref, *, action_size, out_width):
    A = action_size

    low = low_ref[...]
    soc = soc_ref[...]

    # common: Linear -> ReLU -> Linear -> ReLU
    # concat([low, social]) @ W1 == low @ W1[:LOW] + social @ W1[LOW:]
    h1 = (jnp.dot(low, w1l_ref[...], preferred_element_type=jnp.float32)
          + jnp.dot(soc, w1s_ref[...], preferred_element_type=jnp.float32)
          + b1_ref[...])
    h1 = jnp.maximum(h1, 0.0)
    h2 = jnp.dot(h1, w2_ref[...], preferred_element_type=jnp.float32) + b2_ref[...]
    h2 = jnp.maximum(h2, 0.0)

    # fused mu / log_std heads: one MXU push instead of two tiny ones.
    heads = jnp.dot(h2, wh_ref[...], preferred_element_type=jnp.float32) + bh_ref[...]
    mu = heads[:, 0:A]
    log_std = jnp.clip(heads[:, A:2 * A], LOG_STD_MIN, LOG_STD_MAX)
    std = jnp.exp(log_std)

    # reparameterized sample + tanh squash
    eps = eps_ref[...]
    action = mu + std * eps

    # Single EUP tanh over the lane-concatenated [action | mu] block
    # (halves the tanh pushes; each push processes a whole vreg anyway).
    t = jnp.tanh(jnp.concatenate([action, mu], axis=-1))
    squashed = t[:, 0:A]
    tmu = t[:, A:2 * A]

    # Normal(mu, std).log_prob(action); (action - mu)/std == eps.
    # Keep the reference's log(1 - tanh(a)^2 + EPSILON) correction for exact
    # fidelity with the PyTorch module.
    log_prob = (-0.5 * (eps * eps) - log_std - HALF_LOG_2PI
                - jnp.log(1.0 - squashed * squashed + EPSILON))

    # Sum over the (tiny) action axis via static lane slices + VPU adds.
    lp_sum = log_prob[:, 0:1]
    for a in range(1, A):
        lp_sum = lp_sum + log_prob[:, a:a + 1]

    # Single lane-dense, full-width store:
    #   [squashed | tanh(mu) | log_prob | pad].
    # Pad lanes (>= 2A+1) and padded batch rows are never read by the wrapper.
    pad_w = out_width - (2 * A + 1)
    rows = squashed.shape[0]
    packed = jnp.concatenate(
        [squashed, tmu, lp_sum, jnp.zeros((rows, pad_w), jnp.float32)], axis=-1)
    out_ref[...] = packed


def _pick_b_tile(B):
    """Choose the batch tile.

    Minimizes padding (<= ~8 rows per tile), caps the tile at 2048 rows
    (VMEM is a non-issue at these feature sizes), and keeps at least 2 grid
    steps whenever the batch allows it so the "parallel" grid axis can be
    sharded across both v7x TensorCores (costs only ~0.35us extra on
    single-TC v5e/v6e).
    """
    B8 = _round_up(B, 8)
    n_tiles = max(_cdiv(B8, 2048), 2 if B8 >= 16 else 1)
    return _round_up(_cdiv(B, n_tiles), 8)


def actor_forward(low_dim_state, social_vehicles_state, params, eps, *, b_tile=None):
    """Non-training forward: returns (squashed_action, log_prob, tanh(mu))."""
    B = low_dim_state.shape[0]
    low = low_dim_state.astype(jnp.float32)
    # social_feature_encoder is None: flatten each batch element
    # (PyTorch `e.reshape(1, -1)` + cat(0) path).
    soc = social_vehicles_state.reshape(B, -1).astype(jnp.float32)
    eps = eps.astype(jnp.float32)

    w1l, w1s, b1, w2, b2, wh, bh = params
    LOW_DIM = w1l.shape[0]
    SOC_DIM = w1s.shape[0]
    HIDDEN = w2.shape[0]
    A = wh.shape[1] // 2
    OUT_W = _round_up(2 * A + 1, 128)   # lane-dense packed output width

    if b_tile is None:
        b_tile = _pick_b_tile(B)
    B_pad = _round_up(B, b_tile)
    if B_pad != B:
        pad = B_pad - B
        low = jnp.pad(low, ((0, pad), (0, 0)))
        soc = jnp.pad(soc, ((0, pad), (0, 0)))
        eps = jnp.pad(eps, ((0, pad), (0, 0)))

    grid = (B_pad // b_tile,)

    def batch_spec(feat):
        return pl.BlockSpec((b_tile, feat), lambda i: (i, 0))

    def const_spec(shape):
        # weights/biases: same block every iteration -> stay resident in VMEM
        return pl.BlockSpec(shape, lambda i: (0, 0))

    packed = pl.pallas_call(
        functools.partial(actor_kernel, action_size=A, out_width=OUT_W),
        out_shape=jax.ShapeDtypeStruct((B_pad, OUT_W), jnp.float32),
        grid=grid,
        in_specs=[
            batch_spec(LOW_DIM),            # low_dim_states tile
            batch_spec(SOC_DIM),            # flattened social tile
            batch_spec(A),                  # rsample noise tile
            const_spec((LOW_DIM, HIDDEN)),  # W1 (low-dim block)
            const_spec((SOC_DIM, HIDDEN)),  # W1 (social block)
            const_spec((1, HIDDEN)),        # b1
            const_spec((HIDDEN, HIDDEN)),   # W2
            const_spec((1, HIDDEN)),        # b2
            const_spec((HIDDEN, 2 * A)),    # fused [Wmu | Wls]
            const_spec((1, 2 * A)),         # fused [bmu | bls]
        ],
        out_specs=pl.BlockSpec((b_tile, OUT_W), lambda i: (i, 0)),
        compiler_params=pltpu.CompilerParams(
            dimension_semantics=("parallel",)),
    )(low, soc, eps, w1l, w1s, b1, w2, b2, wh, bh)

    # Invariant: only [:B, 0:2A+1] of the slab is ever read.
    packed = packed[:B]
    squashed_action = packed[:, 0:A]
    tanh_mu = packed[:, A:2 * A]
    log_prob = packed[:, 2 * A:2 * A + 1]
    return squashed_action, log_prob, tanh_mu


def init_linear(key, fan_in, fan_out):
    """Deterministic PyTorch-style Linear init: U(-1/sqrt(fan_in), 1/sqrt(fan_in))."""
    kw, kb = jax.random.split(key)
    bound = 1.0 / math.sqrt(fan_in)
    w = jax.random.uniform(kw, (fan_in, fan_out), jnp.float32, -bound, bound)
    b = jax.random.uniform(kb, (1, fan_out), jnp.float32, -bound, bound)
    return w, b


def build_params(key, low_dim, soc_flat, hidden, action_size):
    k1, k2, k3, k4 = jax.random.split(key, 4)
    state_size = low_dim + soc_flat
    w1, b1 = init_linear(k1, state_size, hidden)
    w2, b2 = init_linear(k2, hidden, hidden)
    wmu, bmu = init_linear(k3, hidden, action_size)
    wls, bls = init_linear(k4, hidden, action_size)
    # split W1 for the in-kernel concat fold; fuse the two heads.
    w1_low, w1_soc = w1[:low_dim], w1[low_dim:]
    w_heads = jnp.concatenate([wmu, wls], axis=1)
    b_heads = jnp.concatenate([bmu, bls], axis=1)
    return (w1_low, w1_soc, b1, w2, b2, w_heads, b_heads)


if __name__ == "__main__":
    # Small shapes consistent with the module's forward.
    B = 2              # batch
    LOW_DIM = 8        # low_dim_states feature size
    N_SOCIAL = 4       # social vehicles per batch element
    SOCIAL_FEAT = 5    # features per social vehicle
    SOC_FLAT = N_SOCIAL * SOCIAL_FEAT
    HIDDEN = 32
    ACTION_SIZE = 2

    root = jax.random.PRNGKey(0)
    k_low, k_soc, k_eps, k_par = jax.random.split(root, 4)

    low_dim_state = jax.random.normal(k_low, (B, LOW_DIM), jnp.float32)
    social_vehicles = jax.random.normal(k_soc, (B, N_SOCIAL, SOCIAL_FEAT), jnp.float32)
    eps = jax.random.normal(k_eps, (B, ACTION_SIZE), jnp.float32)  # rsample noise

    params = build_params(k_par, LOW_DIM, SOC_FLAT, HIDDEN, ACTION_SIZE)

    squashed_action, log_prob, tanh_mu = actor_forward(
        low_dim_state, social_vehicles, params, eps)
    jax.block_until_ready((squashed_action, log_prob, tanh_mu))

    assert squashed_action.shape == (B, ACTION_SIZE)
    assert log_prob.shape == (B, 1)
    assert tanh_mu.shape == (B, ACTION_SIZE)
    assert bool(jnp.all(jnp.isfinite(squashed_action)))
    assert bool(jnp.all(jnp.isfinite(log_prob)))
    assert bool(jnp.all(jnp.isfinite(tanh_mu)))
    print("KERNEL_OK")
</pallas_src>

<mosaic_0001>
module attributes {stable_mosaic.version = 11 : i64} {
  func.func @actor_kernel(%arg0: i32, %arg1: memref<8x8xf32, #tpu.memory_space<vmem>>, %arg2: memref<8x20xf32, #tpu.memory_space<vmem>>, %arg3: memref<8x2xf32, #tpu.memory_space<vmem>>, %arg4: memref<8x32xf32, #tpu.memory_space<vmem>>, %arg5: memref<20x32xf32, #tpu.memory_space<vmem>>, %arg6: memref<1x32xf32, #tpu.memory_space<vmem>>, %arg7: memref<32x32xf32, #tpu.memory_space<vmem>>, %arg8: memref<1x32xf32, #tpu.memory_space<vmem>>, %arg9: memref<32x4xf32, #tpu.memory_space<vmem>>, %arg10: memref<1x4xf32, #tpu.memory_space<vmem>>, %arg11: memref<8x128xf32, #tpu.memory_space<vmem>>) attributes {dimension_semantics = [#tpu.dimension_semantics<parallel>], iteration_bounds = array<i64: 1>, scalar_prefetch = 0 : i64, scratch_operands = 0 : i64, tpu.core_type = #tpu.core_type<tc>, window_params = [{transform_indices = @transform_0, window_bounds = array<i64: 8, 8>}, {transform_indices = @transform_1, window_bounds = array<i64: 8, 20>}, {transform_indices = @transform_2, window_bounds = array<i64: 8, 2>}, {pipeline_mode = #tpu.pipeline_mode<synchronous>, transform_indices = @transform_3, window_bounds = array<i64: 8, 32>}, {pipeline_mode = #tpu.pipeline_mode<synchronous>, transform_indices = @transform_4, window_bounds = array<i64: 20, 32>}, {pipeline_mode = #tpu.pipeline_mode<synchronous>, transform_indices = @transform_5, window_bounds = array<i64: 1, 32>}, {pipeline_mode = #tpu.pipeline_mode<synchronous>, transform_indices = @transform_6, window_bounds = array<i64: 32, 32>}, {pipeline_mode = #tpu.pipeline_mode<synchronous>, transform_indices = @transform_7, window_bounds = array<i64: 1, 32>}, {pipeline_mode = #tpu.pipeline_mode<synchronous>, transform_indices = @transform_8, window_bounds = array<i64: 32, 4>}, {pipeline_mode = #tpu.pipeline_mode<synchronous>, transform_indices = @transform_9, window_bounds = array<i64: 1, 4>}, {transform_indices = @transform_10, window_bounds = array<i64: 8, 128>}]} {
    %c0 = arith.constant 0 : index
    %c0_0 = arith.constant 0 : index
    %0 = vector.load %arg1[%c0, %c0_0] : memref<8x8xf32, #tpu.memory_space<vmem>>, vector<8x8xf32>
    %c0_1 = arith.constant 0 : index
    %c0_2 = arith.constant 0 : index
    %1 = vector.load %arg2[%c0_1, %c0_2] : memref<8x20xf32, #tpu.memory_space<vmem>>, vector<8x20xf32>
    %c0_3 = arith.constant 0 : index
    %c0_4 = arith.constant 0 : index
    %2 = vector.load %arg4[%c0_3, %c0_4] : memref<8x32xf32, #tpu.memory_space<vmem>>, vector<8x32xf32>
    %cst = arith.constant dense<0.000000e+00> : vector<8x32xf32>
    %3 = tpu.matmul %0, %2, %cst {dimension_numbers = #tpu.dot_dimension_numbers<[1], [0], [0], [1], [0, 0, 1, 1], [], []>} : vector<8x8xf32>, vector<8x32xf32>, vector<8x32xf32> -> vector<8x32xf32>
    %c0_5 = arith.constant 0 : index
    %c0_6 = arith.constant 0 : index
    %4 = vector.load %arg5[%c0_5, %c0_6] : memref<20x32xf32, #tpu.memory_space<vmem>>, vector<20x32xf32>
    %cst_7 = arith.constant dense<0.000000e+00> : vector<8x32xf32>
    %5 = tpu.matmul %1, %4, %cst_7 {dimension_numbers = #tpu.dot_dimension_numbers<[1], [0], [0], [1], [0, 0, 1, 1], [], []>} : vector<8x20xf32>, vector<20x32xf32>, vector<8x32xf32> -> vector<8x32xf32>
    %6 = arith.addf %3, %5 : vector<8x32xf32>
    %c0_8 = arith.constant 0 : index
    %c0_9 = arith.constant 0 : index
    %7 = vector.load %arg6[%c0_8, %c0_9] : memref<1x32xf32, #tpu.memory_space<vmem>>, vector<1x32xf32>
    %8 = vector.broadcast %7 : vector<1x32xf32> to vector<8x32xf32>
    %9 = arith.addf %6, %8 : vector<8x32xf32>
    %cst_10 = arith.constant 0.000000e+00 : f32
    %10 = vector.broadcast %cst_10 : f32 to vector<8x32xf32>
    %11 = arith.maximumf %9, %10 : vector<8x32xf32>
    %c0_11 = arith.constant 0 : index
    %c0_12 = arith.constant 0 : index
    %12 = vector.load %arg7[%c0_11, %c0_12] : memref<32x32xf32, #tpu.memory_space<vmem>>, vector<32x32xf32>
    %cst_13 = arith.constant dense<0.000000e+00> : vector<8x32xf32>
    %13 = tpu.matmul %11, %12, %cst_13 {dimension_numbers = #tpu.dot_dimension_numbers<[1], [0], [0], [1], [0, 0, 1, 1], [], []>} : vector<8x32xf32>, vector<32x32xf32>, vector<8x32xf32> -> vector<8x32xf32>
    %c0_14 = arith.constant 0 : index
    %c0_15 = arith.constant 0 : index
    %14 = vector.load %arg8[%c0_14, %c0_15] : memref<1x32xf32, #tpu.memory_space<vmem>>, vector<1x32xf32>
    %15 = vector.broadcast %14 : vector<1x32xf32> to vector<8x32xf32>
    %16 = arith.addf %13, %15 : vector<8x32xf32>
    %cst_16 = arith.constant 0.000000e+00 : f32
    %17 = vector.broadcast %cst_16 : f32 to vector<8x32xf32>
    %18 = arith.maximumf %16, %17 : vector<8x32xf32>
    %c0_17 = arith.constant 0 : index
    %c0_18 = arith.constant 0 : index
    %19 = vector.load %arg9[%c0_17, %c0_18] : memref<32x4xf32, #tpu.memory_space<vmem>>, vector<32x4xf32>
    %cst_19 = arith.constant dense<0.000000e+00> : vector<8x4xf32>
    %20 = tpu.matmul %18, %19, %cst_19 {dimension_numbers = #tpu.dot_dimension_numbers<[1], [0], [0], [1], [0, 0, 1, 1], [], []>} : vector<8x32xf32>, vector<32x4xf32>, vector<8x4xf32> -> vector<8x4xf32>
    %c0_20 = arith.constant 0 : index
    %c0_21 = arith.constant 0 : index
    %21 = vector.load %arg10[%c0_20, %c0_21] : memref<1x4xf32, #tpu.memory_space<vmem>>, vector<1x4xf32>
    %22 = vector.broadcast %21 : vector<1x4xf32> to vector<8x4xf32>
    %23 = arith.addf %20, %22 : vector<8x4xf32>
    %24 = vector.extract_strided_slice %23 {offsets = [0, 0], sizes = [8, 2], strides = [1, 1]} : vector<8x4xf32> to vector<8x2xf32>
    %25 = vector.extract_strided_slice %23 {offsets = [0, 2], sizes = [8, 2], strides = [1, 1]} : vector<8x4xf32> to vector<8x2xf32>
    %cst_22 = arith.constant -2.000000e+01 : f32
    %cst_23 = arith.constant 2.000000e+00 : f32
    %26 = vector.broadcast %cst_22 : f32 to vector<8x2xf32>
    %27 = arith.maximumf %26, %25 : vector<8x2xf32>
    %28 = vector.broadcast %cst_23 : f32 to vector<8x2xf32>
    %29 = arith.minimumf %28, %27 : vector<8x2xf32>
    %30 = math.exp %29 : vector<8x2xf32>
    %c0_24 = arith.constant 0 : index
    %c0_25 = arith.constant 0 : index
    %31 = vector.load %arg3[%c0_24, %c0_25] : memref<8x2xf32, #tpu.memory_space<vmem>>, vector<8x2xf32>
    %32 = arith.mulf %30, %31 : vector<8x2xf32>
    %33 = arith.addf %24, %32 : vector<8x2xf32>
    %34 = tpu.concatenate %33, %24 in 1 : vector<8x2xf32>, vector<8x2xf32> -> vector<8x4xf32>
    %35 = math.tanh %34 : vector<8x4xf32>
    %36 = vector.extract_strided_slice %35 {offsets = [0, 0], sizes = [8, 2], strides = [1, 1]} : vector<8x4xf32> to vector<8x2xf32>
    %37 = vector.extract_strided_slice %35 {offsets = [0, 2], sizes = [8, 2], strides = [1, 1]} : vector<8x4xf32> to vector<8x2xf32>
    %38 = arith.mulf %31, %31 : vector<8x2xf32>
    %cst_26 = arith.constant -5.000000e-01 : f32
    %39 = vector.broadcast %cst_26 : f32 to vector<8x2xf32>
    %40 = arith.mulf %39, %38 : vector<8x2xf32>
    %41 = arith.subf %40, %29 : vector<8x2xf32>
    %cst_27 = arith.constant 0.918938517 : f32
    %42 = vector.broadcast %cst_27 : f32 to vector<8x2xf32>
    %43 = arith.subf %41, %42 : vector<8x2xf32>
    %44 = arith.mulf %36, %36 : vector<8x2xf32>
    %cst_28 = arith.constant 1.000000e+00 : f32
    %45 = vector.broadcast %cst_28 : f32 to vector<8x2xf32>
    %46 = arith.subf %45, %44 : vector<8x2xf32>
    %cst_29 = arith.constant 9.99999997E-7 : f32
    %47 = vector.broadcast %cst_29 : f32 to vector<8x2xf32>
    %48 = arith.addf %46, %47 : vector<8x2xf32>
    %49 = math.log %48 : vector<8x2xf32>
    %50 = arith.subf %43, %49 : vector<8x2xf32>
    %51 = vector.extract_strided_slice %50 {offsets = [0, 0], sizes = [8, 1], strides = [1, 1]} : vector<8x2xf32> to vector<8x1xf32>
    %52 = vector.extract_strided_slice %50 {offsets = [0, 1], sizes = [8, 1], strides = [1, 1]} : vector<8x2xf32> to vector<8x1xf32>
    %53 = arith.addf %51, %52 : vector<8x1xf32>
    %cst_30 = arith.constant 0.000000e+00 : f32
    %54 = vector.broadcast %cst_30 : f32 to vector<8x123xf32>
    %55 = tpu.concatenate %36, %37, %53, %54 in 1 : vector<8x2xf32>, vector<8x2xf32>, vector<8x1xf32>, vector<8x123xf32> -> vector<8x128xf32>
    %c0_31 = arith.constant 0 : index
    %c0_32 = arith.constant 0 : index
    %56 = vector.load %arg11[%c0_31, %c0_32] : memref<8x128xf32, #tpu.memory_space<vmem>>, vector<8x128xf32>
    tpu.vector_store %arg11[%c0_31, %c0_32], %55 {strides = array<i32>} : memref<8x128xf32, #tpu.memory_space<vmem>>, vector<8x128xf32>,
    return
  }
  func.func @transform_0(%arg0: i32) -> (i32, i32) {
    %c0_i32 = arith.constant 0 : i32
    %c0_i32_0 = arith.constant 0 : i32
    return %arg0, %c0_i32 : i32, i32
  }
  func.func @transform_1(%arg0: i32) -> (i32, i32) {
    %c0_i32 = arith.constant 0 : i32
    %c0_i32_0 = arith.constant 0 : i32
    return %arg0, %c0_i32 : i32, i32
  }
  func.func @transform_2(%arg0: i32) -> (i32, i32) {
    %c0_i32 = arith.constant 0 : i32
    %c0_i32_0 = arith.constant 0 : i32
    return %arg0, %c0_i32 : i32, i32
  }
  func.func @transform_3(%arg0: i32) -> (i32, i32) {
    %c0_i32 = arith.constant 0 : i32
    %c0_i32_0 = arith.constant 0 : i32
    %c0_i32_1 = arith.constant 0 : i32
    return %c0_i32, %c0_i32_0 : i32, i32
  }
  func.func @transform_4(%arg0: i32) -> (i32, i32) {
    %c0_i32 = arith.constant 0 : i32
    %c0_i32_0 = arith.constant 0 : i32
    %c0_i32_1 = arith.constant 0 : i32
    return %c0_i32, %c0_i32_0 : i32, i32
  }
  func.func @transform_5(%arg0: i32) -> (i32, i32) {
    %c0_i32 = arith.constant 0 : i32
    %c0_i32_0 = arith.constant 0 : i32
    %c0_i32_1 = arith.constant 0 : i32
    return %c0_i32, %c0_i32_0 : i32, i32
  }
  func.func @transform_6(%arg0: i32) -> (i32, i32) {
    %c0_i32 = arith.constant 0 : i32
    %c0_i32_0 = arith.constant 0 : i32
    %c0_i32_1 = arith.constant 0 : i32
    return %c0_i32, %c0_i32_0 : i32, i32
  }
  func.func @transform_7(%arg0: i32) -> (i32, i32) {
    %c0_i32 = arith.constant 0 : i32
    %c0_i32_0 = arith.constant 0 : i32
    %c0_i32_1 = arith.constant 0 : i32
    return %c0_i32, %c0_i32_0 : i32, i32
  }
  func.func @transform_8(%arg0: i32) -> (i32, i32) {
    %c0_i32 = arith.constant 0 : i32
    %c0_i32_0 = arith.constant 0 : i32
    %c0_i32_1 = arith.constant 0 : i32
    return %c0_i32, %c0_i32_0 : i32, i32
  }
  func.func @transform_9(%arg0: i32) -> (i32, i32) {
    %c0_i32 = arith.constant 0 : i32
    %c0_i32_0 = arith.constant 0 : i32
    %c0_i32_1 = arith.constant 0 : i32
    return %c0_i32, %c0_i32_0 : i32, i32
  }
  func.func @transform_10(%arg0: i32) -> (i32, i32) {
    %c0_i32 = arith.constant 0 : i32
    %c0_i32_0 = arith.constant 0 : i32
    return %arg0, %c0_i32 : i32, i32
  }
}

</mosaic_0001>

<bundles_post_ra>
// kernel: tpu_custom_call.1
= control target key start
LH: loop header
LB: loop body
LE: loop exit
PB: predicated region body
PF: predicated region fallthrough
CT: control target
= control target key end

     0   :  { %15 = vsyncpa [#allocation3], 0  ;;  %s824_s0 = inlined_call_operand.vmem [shape: f32[8,8], index: 0, kind: input, shape index: {}]   ;;  %s825_s1 = inlined_call_operand.hbm [shape: f32[8,20], index: 1, kind: input, shape index: {}]   ;;  %s826_s2 = inlined_call_operand.vmem [shape: f32[8,2], index: 2, kind: input, shape index: {}]   ;;  %s827_s3 = inlined_call_operand.hbm [shape: f32[8,32], index: 3, kind: input, shape index: {}]   ;;  %s828_s4 = inlined_call_operand.vmem [shape: f32[20,32], index: 4, kind: input, shape index: {}]   ;;  %s829_s5 = inlined_call_operand.hbm [shape: f32[1,32], index: 5, kind: input, shape index: {}]   ;;  %s830_s6 = inlined_call_operand.vmem [shape: f32[32,32], index: 6, kind: input, shape index: {}]   ;;  %s831_s7 = inlined_call_operand.vmem [shape: f32[1,32], index: 7, kind: input, shape index: {}]   ;;  %s832_s8 = inlined_call_operand.vmem [shape: f32[32,4], index: 8, kind: input, shape index: {}]   ;;  %s833_s9 = inlined_call_operand.vmem [shape: f32[1,4], index: 9, kind: input, shape index: {}]   ;;  %s834_s10 = inlined_call_operand.hbm [shape: f32[8,128], index: 10, kind: output, shape index: {}]  }
   0x1   :  { %16 = vsyncpa [#allocation6], 0 }
   0x2   :  { %17 = vsyncpa [#allocation4], 0  ;;  %s661_s13 = smov [#allocation5]   ;;  %s662_s15 = smov [#allocation2]  }
   0x3   :  { %s38_s14 = sshll.u32 %s661_s13, 4  ;;  %s26_s16 = sshll.u32 %s662_s15, 4  ;;  %s39_s14 = int_to_ptr.vmem [resolvable:$true] %s38_s14  ;;  %s27_s16 = int_to_ptr.vmem [resolvable:$true] %s26_s16 }
   0x4   :  { %s567_s19 = scalar_lea.hbm %s827_s3, 128 }
   0x5   :  { %p568_p0 = scmp.ne.s32.totalorder %s827_s3, %s567_s19  ;;  %p571_p1 = scmp.lt.u32.totalorder %s567_s19, %s827_s3 }
   0x7   :  { %p573_p2 = pnand %p571_p1, %p568_p0 }
   0x9   :  { %576 = shalt.err (!%p573_p2)
}
   0xa   :  { %s577_s24 = scalar_lea.vmem %s39_s14, 128  ;;  %p582_p4 = scmp.lt.s32.totalorder %s39_s14, %s39_s14 }
   0xb   :  { %p578_p3 = scmp.ne.s32.totalorder %s39_s14, %s577_s24  ;;  %p583_p5 = scmp.lt.s32.totalorder %s577_s24, %s577_s24 }
   0xd   :  { %p584_p6 = por %p583_p5, %p582_p4 }
   0xf   :  { %p585_p7 = pnand %p584_p6, %p578_p3 }
  0x11   :  { %588 = shalt.err (!%p585_p7)
}
  0x12   :  { %41 = dma.hbm_to_vmem [thread:$0]  %s827_s3, 128, %s39_s14, [#allocation6]  }
  0x13   :  { %s589_s29 = scalar_lea.hbm %s825_s1, 128 }
  0x14   :  { %p590_p8 = scmp.ne.s32.totalorder %s825_s1, %s589_s29  ;;  %p593_p9 = scmp.lt.u32.totalorder %s589_s29, %s825_s1 }
  0x16   :  { %p595_p10 = pnand %p593_p9, %p590_p8 }
  0x18   :  { %598 = shalt.err (!%p595_p10)
}
  0x19   :  { %s599_s15 = scalar_lea.vmem %s27_s16, 128  ;;  %p604_p12 = scmp.lt.s32.totalorder %s27_s16, %s27_s16 }
  0x1a   :  { %p600_p11 = scmp.ne.s32.totalorder %s27_s16, %s599_s15  ;;  %p605_p13 = scmp.lt.s32.totalorder %s599_s15, %s599_s15 }
  0x1c   :  { %p606_p0 = por %p605_p13, %p604_p12 }
  0x1e   :  { %p607_p1 = pnand %p606_p0, %p600_p11 }
  0x20   :  { %610 = shalt.err (!%p607_p1)
}
  0x21   :  { %29 = dma.hbm_to_vmem [thread:$0]  %s825_s1, 128, %s27_s16, [#allocation3]  }
  0x22   :  { %s663_s17 = smov [#allocation7]   ;;  %s611_s21 = scalar_lea.hbm %s829_s5, 16 }
  0x23   :  { %s50_s18 = sshll.u32 %s663_s17, 4  ;;  %p612_p2 = scmp.ne.s32.totalorder %s829_s5, %s611_s21  ;;  %s51_s18 = int_to_ptr.vmem [resolvable:$true] %s50_s18 }
  0x24   :  { %p615_p3 = scmp.lt.u32.totalorder %s611_s21, %s829_s5 }
  0x26   :  { %p617_p4 = pnand %p615_p3, %p612_p2 }
  0x28   :  { %620 = shalt.err (!%p617_p4)
}
  0x29   :  { %s621_s26 = scalar_lea.vmem %s51_s18, 16  ;;  %s625_s1 = scalar_lea.vmem %s51_s18, 32 }
  0x2a   :  { %p622_p5 = scmp.ne.s32.totalorder %s51_s18, %s621_s26  ;;  %p626_p6 = scmp.lt.s32.totalorder %s51_s18, %s51_s18 }
  0x2b   :  { %p627_p7 = scmp.lt.s32.totalorder %s625_s1, %s621_s26 }
  0x2d   :  { %p628_p8 = por %p627_p7, %p626_p6 }
  0x2f   :  { %p629_p9 = pnand %p628_p8, %p622_p5 }
  0x31   :  { %632 = shalt.err (!%p629_p9)
}
  0x32   :  { %53 = dma.hbm_to_vmem [thread:$0]  %s829_s5, 16, %s51_s18, [#allocation6]  }
  0x33   :  { %655 = dma.done.wait [#allocation3], 128  }
  0x34   :  { %656 = vsyncadd [#allocation3], 4294967168 }
  0x35   :  { %657 = dma.done.wait [#allocation6], 144  }
  0x36   :  { %658 = vsyncadd [#allocation6], 4294967152  ;;  %v664_v0 = vmov 0.0|0.0   ;;  %v665_v1 = vmov 0.0   ;;  %vm666_vm0 = vmmov 0   ;;  %vm155_vm1 = vcmask 64512  }
  0x37   :  { %535 = vmatprep.subr.bf16.mxu0 %v664_v0  ;;  %508 = vmatprep.subr.mxu1 %v665_v1  ;;  %v74_v2 = vld [vmem:[%s828_s4] sm:$0xff]  ;;  %v75_v3 = vld [vmem:[%s828_s4 + $0x8] sm:$0xff]  ;;  %v76_v7 = vld [vmem:[%s828_s4 + $0x10] sm:$0xf]  ;;  %vm81_vm2 = vcmask 1043456   ;;  %vm77_vm3 = vcmask 162816  }
  0x38   :  { %510 = vmatprep.mubr.msk.f32.mxu1 %vm666_vm0, %v665_v1  ;;  %505 = vmatprep.mubr.msk.f32.mxu0 %vm666_vm0, %v665_v1  ;;  %v73_v4 = vld [vmem:[#allocation5] sm:$0xff]  ;;  %v536_v5 = vpack.c.bf16 %v75_v3, %v74_v2  ;;  %v71_v6 = vld [vmem:[%s824_s0] sm:$0xff]  ;;  %v240_v12 = vld [vmem:[%s830_s6 + $0x10] sm:$0xff]  ;;  %vm249_vm4 = vcmask 261120   ;;  %s667_s28 = smov 2   ;;  %vm427_vm5 = vcmask 15360  }
  0x39   :  { %509 = vmatpush3.msra.mxu1 %v73_v4  ;;  %v72_v8 = vld [vmem:[#allocation2] sm:$0xff]  ;;  %v239_v10 = vld [vmem:[%s830_s6 + $0x8] sm:$0xff]  ;;  %v241_v13 = vld [vmem:[%s830_s6 + $0x18] sm:$0xff]  ;;  %vm453_vm6 = vcmask 31744   ;;  %vm455_vm7 = vcmask 39936  }
  0x3a   :  { %511 = vmatmul.mubr.msk.f32.vlgmr.msra.gmra.mrb[0].mxu1 %vm155_vm1, %v71_v6  ;;  %538 = vmatprep.subr.bf16.mxu1 %v664_v0  ;;  %v238_v9 = vld [vmem:[%s830_s6] sm:$0xff]  ;;  %v542_v14 = vpack.c.bf16 %v241_v13, %v240_v12  ;;  %v325_v16 = vld [vmem:[%s832_s8 + $0x8] sm:$0xff]  ;;  %v477_v21 = vld [vmem:[#allocation7] ss:$0 sm:$0xff] }
  0x3b   :  { %537 = vmatpush3.bf16.msra.mxu0 %v536_v5  ;;  %521 = vmatprep.mubr.msk.f32.mxu1 %vm666_vm0, %v665_v1  ;;  %v539_v11 = vpack.c.bf16 %v239_v10, %v238_v9  ;;  %v324_v15 = vld [vmem:[%s832_s8] sm:$0xff]  ;;  %v326_v26 = vld [vmem:[%s832_s8 + $0x10] sm:$0xff]  ;;  %v327_v27 = vld [vmem:[%s832_s8 + $0x18] sm:$0xff]  ;;  %s670_s8 = smov 4  }
  0x3c   :  { %503 = vmatprep.subr.mxu0 %v665_v1  ;;  %v545_v17 = vpack.c.bf16 %v325_v16, %v324_v15  ;;  %v548_v28 = vpack.c.bf16 %v327_v27, %v326_v26  ;;  %v412_v29 = vld [vmem:[%s826_s2] sm:$0xff]  ;;  %s668_s2 = smov 126  }
  0x3d   :  { %540 = vmatpush3.bf16.msra.mxu1 %v539_v11  ;;  %414 = vrot.lane.b32.xlu0 %v412_v29, %s667_s28  ;;  %v478_v30 = vld [vmem:[%s831_s7] ss:$0 sm:$0xff]  ;;  %v430_v53 = vmul.f32 %v412_v29, %v412_v29  ;;  %s669_s7 = smov 127  }
  0x3e   :  { %541 = vmatprep.subr.bf16.mxu1 %v664_v0  ;;  %v480_v35 = vld [vmem:[%s833_s9] ss:$0 sm:$0xff]  ;;  %s671_s9 = smov [#allocation8]  }
  0x3f   :  { %504 = vmatpush3.msk.msra.mxu0 %vm81_vm2, %v76_v7  ;;  %v431_v54 = vmul.f32 -0.5, %v430_v53  ;;  %s464_s12 = sshll.u32 %s671_s9, 4  ;;  %s465_s12 = int_to_ptr.vmem [resolvable:$true] %s464_s12 }
  0x40   :  { %506 = vmatmul.mubr.msk.f32.vlgmr.msra.gmra.mrb[0].mxu0 %vm77_vm3, %v72_v8  ;;  %544 = vmatprep.subr.bf16.mxu0 %v664_v0  ;;  %s633_s13 = scalar_lea.vmem %s465_s12, 128  ;;  %p638_p11 = scmp.lt.s32.totalorder %s465_s12, %s465_s12 }
  0x41   :  { %532 = vmatprep.mubr.msk.f32.mxu0 %vm666_vm0, %v665_v1  ;;  %543 = vmatpush3.bf16.msra.mxu1 %v542_v14  ;;  %p634_p10 = scmp.ne.s32.totalorder %s465_s12, %s633_s13  ;;  %p639_p12 = scmp.lt.s32.totalorder %s633_s13, %s633_s13 }
  0x42   :  { %546 = vmatpush3.bf16.msra.mxu0 %v545_v17 }
  0x43   :  { %547 = vmatprep.subr.bf16.mxu0 %v664_v0  ;;  %p640_p13 = por %p639_p12, %p638_p11 }
  0x45   :  { %p641_p0 = pnand %p640_p13, %p634_p10 }
  0x46   :  { %549 = vmatpush3.bf16.msra.mxu0 %v548_v28 }
  0xaf   :  { %v415_v42 = vpop.permute.xlu0 %414 }
 0x10d   :  { %v225_v18 = vpop.f32.mrb[0].mxu1 }
 0x10e   :  { %v512_v19 = vpop.f32.mrb[1].mxu1 }
 0x113   :  { %v151_v20 = vpop.f32.mrb[0].mxu0 }
 0x114   :  { %v226_v22 = vadd.f32 %v225_v18, %v151_v20  ;;  %v507_v23 = vpop.f32.mrb[1].mxu0 }
 0x116   :  { %v236_v24 = vadd.f32 %v477_v21, %v226_v22 }
 0x118   :  { %v237_v25 = vmax.f32 %v236_v24, 0.0 }
 0x11a   :  { %522 = vmatmul.mubr.msk.f32.vlgmr.msra.gmra.mrb[2].mxu1 %vm249_vm4, %v237_v25 }
 0x1ed   :  { %v319_v31 = vpop.f32.mrb[2].mxu1 }
 0x1ee   :  { %v320_v32 = vadd.f32 %v478_v30, %v319_v31  ;;  %v523_v33 = vpop.f32.mrb[3].mxu1 }
 0x1f0   :  { %v323_v34 = vmax.f32 %v320_v32, 0.0 }
 0x1f2   :  { %533 = vmatmul.mubr.msk.f32.vlgmr.msra.gmra.mrb[2].mxu0 %vm249_vm4, %v323_v34 }
 0x2c5   :  { %v404_v36 = vpop.f32.mrb[2].mxu0 }
 0x2c6   :  { %v405_v37 = vadd.f32 %v480_v35, %v404_v36  ;;  %v534_v38 = vpop.f32.mrb[3].mxu0 }
 0x2c8   :  { %424 = vrot.lane.b32.xlu1 %v405_v37, %s667_s28  ;;  %v408_v39 = vmax.f32 %v405_v37, -20.0 }
 0x2ca   :  { %v409_v40 = vmin.f32 %v408_v39, 2.0 }
 0x2cc   :  { %433 = vrot.lane.b32.xlu1 %v409_v40, %s668_s2  ;;  %v410_v41 = vmul.f32 1.442695, %v409_v40 }
 0x2ce   :  { %561 = vpow2.f32 %v410_v41 }
 0x2d8   :  { %v562_v43 = vpop.eup %561 }
 0x2d9   :  { %v417_v44 = vmul.f32 %v562_v43, %v415_v42 }
 0x2db   :  { %419 = vrot.lane.b32.xlu0 %v417_v44, %s668_s2 }
 0x33a   :  { %v425_v47 = vpop.permute.xlu1 %424 }
 0x33e   :  { %v434_v55 = vpop.permute.xlu1 %433 }
 0x33f   :  { %v436_v56 = vsub.f32 %v431_v54, %v434_v55 }
 0x341   :  { %v482_v58 = vadd.f32 -0.9189385, %v436_v56 }
 0x34d   :  { %v420_v45 = vpop.permute.xlu0 %419 }
 0x34e   :  { %v422_v46 = vadd.f32 %v420_v45, %v405_v37 }
 0x350   :  { %v428_v48 = vsel %vm427_vm5, %v422_v46, %v425_v47 }
 0x351   :  { %563 = vtanh.f32 %v428_v48 }
 0x35b   :  { %v564_v49 = vpop.eup %563 }
 0x35c   :  { %v438_v50 = vmul.f32 %v564_v49, %v564_v49 }
 0x35e   :  { %v439_v51 = vsub.f32 1.0, %v438_v50 }
 0x360   :  { %v440_v52 = vadd.f32 1e-06, %v439_v51 }
 0x362   :  { %565 = vlog2.f32 %v440_v52 }
 0x36c   :  { %v566_v57 = vpop.eup %565 }
 0x36d   :  { %v442_v59 = vmul.f32 0.6931472, %v566_v57 }
 0x36f   :  { %v443_v60 = vsub.f32 %v482_v58, %v442_v59 }
 0x371   :  { %445 = vrot.lane.b32.xlu0 %v443_v60, %s669_s7 }
 0x3e3   :  { %v446_v61 = vpop.permute.xlu0 %445 }
 0x3e4   :  { %v448_v62 = vadd.f32 %v446_v61, %v443_v60 }
 0x3e6   :  { %450 = vrot.lane.b32.xlu1 %v448_v62, %s670_s8 }
 0x458   :  { %v451_v63 = vpop.permute.xlu1 %450 }
 0x459   :  { %v454_v0 = vsel %vm453_vm6, %v564_v49, %v451_v63 }
 0x45a   :  { %v456_v1 = vsel %vm455_vm7, %v454_v0, 0.0 }
 0x45b   :  { %457 = vst [vmem:[#allocation8] sm:$0xff] %v456_v1 }
 0x45c   :  { %644 = shalt.err (!%p641_p0)
}
 0x45d   :  { %s645_s0 = scalar_lea.hbm %s834_s10, 128 }
 0x45e   :  { %p646_p1 = scmp.ne.s32.totalorder %s834_s10, %s645_s0  ;;  %p649_p2 = scmp.lt.u32.totalorder %s645_s0, %s834_s10 }
 0x460   :  { %p651_p3 = pnand %p649_p2, %p646_p1 }
 0x462   :  { %654 = shalt.err (!%p651_p3)
}
 0x463   :  { %467 = dma.vmem_to_hbm [thread:$0]  %s465_s12, 128, %s834_s10, [#allocation4]  }
 0x464   :  { %659 = dma.done.wait [#allocation4], 128  }
 0x465   :  { %660 = vsyncadd [#allocation4], 4294967168 }
 0x466   :  { %471 = vsyncpa [#allocation3], 1 }
 0x467   :  { %472 = vsyncpa [#allocation6], 1 }
 0x468   :  { %473 = vsyncpa [#allocation4], 1 }

</bundles_post_ra>
